<compile_context>
chip_gen: v7x
topology: tpu7x:2x2x1
jax: 0.10.0
libtpu: 0.0.40
codegen_flags: <defaults>
</compile_context>

<pallas_src>
import jax
import jax.numpy as jnp
import numpy as np
from jax.experimental import pallas as pl
from jax.experimental.pallas import tpu as pltpu


def _swish_kernel_weighted(x_ref, sigma_ref, o_ref):
    x = x_ref[...].astype(jnp.float32)          # (tile_r, tile_c)
    s = sigma_ref[...].astype(jnp.float32)      # (tile_r, 1) or (1, tile_c)
    o_ref[...] = (x * jax.nn.sigmoid(x * s)).astype(o_ref.dtype)


def _swish_kernel_plain(x_ref, o_ref):
    x = x_ref[...].astype(jnp.float32)
    o_ref[...] = (x * jax.nn.sigmoid(x)).astype(o_ref.dtype)


def _round_up(a, b):
    return (a + b - 1) // b * b


def _choose_tiles(rows, cols, itemsize, block_bytes):
    """Pick an (8,128)-legal (tile_r, tile_c); prefer full lane width."""
    row_align = max(8, 32 // itemsize)          # 8 f32, 16 bf16, 32 int8/fp8
    cols_p128 = _round_up(cols, 128)            # lane footprint of a full row
    if row_align * cols_p128 * itemsize <= block_bytes:
        # Full-width lane tile: one j step, contiguous HBM DMA per block.
        # tile_c == full dim -> legal even if cols is not a multiple of 128.
        tile_c = cols
        tile_r = (block_bytes // (cols_p128 * itemsize)) // row_align * row_align
        tile_r = max(row_align, int(tile_r))
    else:
        # Very wide last dim: split lanes into multiples of 128.
        tile_c = (block_bytes // (row_align * itemsize)) // 128 * 128
        tile_c = int(max(128, min(tile_c, cols_p128)))
        tile_r = row_align
    if tile_r >= rows:
        tile_r = rows                           # == full dim -> legal for any rows
    return tile_r, tile_c


def swish_pallas(x, weight=None, *, block_bytes=4 << 20):
    """x: (N, C, *spatial), (N, C) or (N,).  weight: None, (1,) or (C,)."""
    orig_shape = x.shape
    orig_dtype = x.dtype

    if x.ndim >= 3:
        # Channel dim is dim 1 -> rows = N*C on sublanes, pixels on lanes.
        N, C = x.shape[0], x.shape[1]
        rows, cols = N * C, int(np.prod(x.shape[2:]))
        x2 = x.reshape(rows, cols)
        channel_on_rows = True
        if weight is not None:
            w = jnp.asarray(weight, dtype=jnp.float32).reshape(1, -1)  # (1,1)|(1,C)
            sigma2 = jnp.broadcast_to(w, (N, C)).reshape(rows, 1)
    else:
        # 1-D / 2-D input: PyTorch broadcasting puts weight on the last dim,
        # so keep the feature dim on lanes (no 1 -> 128 lane padding blowup).
        x2 = x.reshape(1, -1) if x.ndim < 2 else x
        rows, cols = x2.shape
        channel_on_rows = False
        if weight is not None:
            w = jnp.asarray(weight, dtype=jnp.float32).reshape(1, -1)
            sigma2 = jnp.broadcast_to(w, (1, cols))

    itemsize = jnp.dtype(orig_dtype).itemsize
    tile_r, tile_c = _choose_tiles(rows, cols, itemsize, block_bytes)
    grid = (pl.cdiv(rows, tile_r), pl.cdiv(cols, tile_c))

    x_spec = pl.BlockSpec((tile_r, tile_c), lambda i, j: (i, j))
    out_spec = pl.BlockSpec((tile_r, tile_c), lambda i, j: (i, j))
    cparams = pltpu.CompilerParams(
        dimension_semantics=("parallel", "parallel"),
        vmem_limit_bytes=32 << 20,
    )
    out_shape = jax.ShapeDtypeStruct((rows, cols), orig_dtype)

    if weight is None:
        out2 = pl.pallas_call(
            _swish_kernel_plain,
            out_shape=out_shape,
            grid_spec=pltpu.PrefetchScalarGridSpec(
                num_scalar_prefetch=0,
                grid=grid,
                in_specs=[x_spec],
                out_specs=out_spec,
            ),
            compiler_params=cparams,
        )(x2)
    else:
        if channel_on_rows:
            sigma_spec = pl.BlockSpec((tile_r, 1), lambda i, j: (i, 0))
        else:
            sigma_spec = pl.BlockSpec((1, tile_c), lambda i, j: (0, j))
        out2 = pl.pallas_call(
            _swish_kernel_weighted,
            out_shape=out_shape,
            grid_spec=pltpu.PrefetchScalarGridSpec(
                num_scalar_prefetch=0,
                grid=grid,
                in_specs=[x_spec, sigma_spec],
                out_specs=out_spec,
            ),
            compiler_params=cparams,
        )(x2, sigma2)

    return out2.reshape(orig_shape)


if __name__ == "__main__":
    key = jax.random.PRNGKey(0)
    k1, k2, k3, k4, k5 = jax.random.split(key, 5)

    # --- main test: NCHW, per-channel weight (num_parameters = C) ---
    N, C, H, W = 2, 4, 16, 16
    x = jax.random.normal(k1, (N, C, H, W), dtype=jnp.float32)
    init = 0.25
    weight = jnp.full((C,), init, dtype=jnp.float32)
    out = jax.block_until_ready(swish_pallas(x, weight))
    ref = x * jax.nn.sigmoid(x * weight.reshape(1, C, 1, 1))
    np.testing.assert_allclose(np.asarray(out), np.asarray(ref), rtol=1e-5, atol=1e-5)

    # --- num_parameters = 0 (weight None -> plain swish) ---
    out0 = jax.block_until_ready(swish_pallas(x, None))
    ref0 = x * jax.nn.sigmoid(x)
    np.testing.assert_allclose(np.asarray(out0), np.asarray(ref0), rtol=1e-5, atol=1e-5)

    # --- odd shape (tiles equal full dims, no pad needed) ---
    x_odd = jax.random.normal(k2, (2, 3, 7, 7), dtype=jnp.float32)
    w_odd = jnp.full((3,), 0.5, dtype=jnp.float32)
    out_odd = jax.block_until_ready(swish_pallas(x_odd, w_odd))
    ref_odd = x_odd * jax.nn.sigmoid(x_odd * w_odd.reshape(1, 3, 1, 1))
    np.testing.assert_allclose(np.asarray(out_odd), np.asarray(ref_odd),
                               rtol=1e-5, atol=1e-5)

    # --- boundary-masking paths (small forced block size, no host pad/slice) ---
    # lane-axis boundary: cols = 1056, tile_c = 128 -> last j block masked
    x_lb = jax.random.normal(k3, (2, 4, 32, 33), dtype=jnp.float32)
    w_lb = jnp.linspace(0.1, 0.9, 4, dtype=jnp.float32)
    out_lb = jax.block_until_ready(swish_pallas(x_lb, w_lb, block_bytes=4096))
    ref_lb = x_lb * jax.nn.sigmoid(x_lb * w_lb.reshape(1, 4, 1, 1))
    np.testing.assert_allclose(np.asarray(out_lb), np.asarray(ref_lb),
                               rtol=1e-5, atol=1e-5)
    # row-axis boundary: rows = 10, tile_r = 8 -> last i block masked
    x_rb = jax.random.normal(k4, (2, 5, 16, 16), dtype=jnp.float32)
    w_rb = jnp.linspace(0.2, 1.0, 5, dtype=jnp.float32)
    out_rb = jax.block_until_ready(swish_pallas(x_rb, w_rb, block_bytes=8192))
    ref_rb = x_rb * jax.nn.sigmoid(x_rb * w_rb.reshape(1, 5, 1, 1))
    np.testing.assert_allclose(np.asarray(out_rb), np.asarray(ref_rb),
                               rtol=1e-5, atol=1e-5)

    # --- 2-D input: weight broadcasts along the last (feature) dim ---
    x2d = jax.random.normal(k5, (8, 32), dtype=jnp.float32)
    w2d = jnp.linspace(0.1, 1.0, 32, dtype=jnp.float32)
    out2d = jax.block_until_ready(swish_pallas(x2d, w2d))
    ref2d = x2d * jax.nn.sigmoid(x2d * w2d)
    np.testing.assert_allclose(np.asarray(out2d), np.asarray(ref2d),
                               rtol=1e-5, atol=1e-5)

    # --- 1-D input, weight None (the docstring example) ---
    x1d = jax.random.normal(k1, (16,), dtype=jnp.float32)
    out1d = jax.block_until_ready(swish_pallas(x1d, None))
    ref1d = x1d * jax.nn.sigmoid(x1d)
    np.testing.assert_allclose(np.asarray(out1d), np.asarray(ref1d),
                               rtol=1e-5, atol=1e-5)

    # --- bf16: f32 compute inside the kernel, weight kept in f32 ---
    x_bf = jax.random.normal(k2, (N, C, H, W), dtype=jnp.float32).astype(jnp.bfloat16)
    out_bf = jax.block_until_ready(swish_pallas(x_bf, weight))
    xf = x_bf.astype(jnp.float32)
    ref_bf = (xf * jax.nn.sigmoid(xf * init)).astype(jnp.bfloat16)
    np.testing.assert_allclose(np.asarray(out_bf, dtype=np.float32),
                               np.asarray(ref_bf, dtype=np.float32),
                               rtol=2e-2, atol=2e-2)

    print("KERNEL_OK")
</pallas_src>

<mosaic_0001>
module attributes {stable_mosaic.version = 11 : i64} {
  func.func @_swish_kernel_weighted(%arg0: i32, %arg1: i32, %arg2: memref<8x256xf32, #tpu.memory_space<vmem>>, %arg3: memref<8x1xf32, #tpu.memory_space<vmem>>, %arg4: memref<8x256xf32, #tpu.memory_space<vmem>>) attributes {dimension_semantics = [#tpu.dimension_semantics<parallel>, #tpu.dimension_semantics<parallel>], iteration_bounds = array<i64: 1, 1>, scalar_prefetch = 0 : i64, scratch_operands = 0 : i64, tpu.core_type = #tpu.core_type<tc>, window_params = [{transform_indices = @transform_0, window_bounds = array<i64: 8, 256>}, {transform_indices = @transform_1, window_bounds = array<i64: 8, 1>}, {transform_indices = @transform_2, window_bounds = array<i64: 8, 256>}]} {
    %c0 = arith.constant 0 : index
    %c0_0 = arith.constant 0 : index
    %0 = vector.load %arg2[%c0, %c0_0] : memref<8x256xf32, #tpu.memory_space<vmem>>, vector<8x256xf32>
    %c0_1 = arith.constant 0 : index
    %c0_2 = arith.constant 0 : index
    %1 = vector.load %arg3[%c0_1, %c0_2] : memref<8x1xf32, #tpu.memory_space<vmem>>, vector<8x1xf32>
    %2 = vector.broadcast %1 : vector<8x1xf32> to vector<8x256xf32>
    %3 = arith.mulf %0, %2 : vector<8x256xf32>
    %4 = arith.negf %3 : vector<8x256xf32>
    %5 = math.exp %4 : vector<8x256xf32>
    %cst = arith.constant 1.000000e+00 : f32
    %6 = vector.broadcast %cst : f32 to vector<8x256xf32>
    %7 = arith.addf %6, %5 : vector<8x256xf32>
    %8 = arith.divf %6, %7 : vector<8x256xf32>
    %9 = arith.mulf %0, %8 : vector<8x256xf32>
    %c0_3 = arith.constant 0 : index
    %c0_4 = arith.constant 0 : index
    %10 = vector.load %arg4[%c0_3, %c0_4] : memref<8x256xf32, #tpu.memory_space<vmem>>, vector<8x256xf32>
    tpu.vector_store %arg4[%c0_3, %c0_4], %9 {strides = array<i32>} : memref<8x256xf32, #tpu.memory_space<vmem>>, vector<8x256xf32>,
    return
  }
  func.func @transform_0(%arg0: i32, %arg1: i32) -> (i32, i32) {
    %c0_i32 = arith.constant 0 : i32
    return %arg0, %arg1 : i32, i32
  }
  func.func @transform_1(%arg0: i32, %arg1: i32) -> (i32, i32) {
    %c0_i32 = arith.constant 0 : i32
    %c0_i32_0 = arith.constant 0 : i32
    return %arg0, %c0_i32 : i32, i32
  }
  func.func @transform_2(%arg0: i32, %arg1: i32) -> (i32, i32) {
    %c0_i32 = arith.constant 0 : i32
    return %arg0, %arg1 : i32, i32
  }
}

</mosaic_0001>

<bundles_post_ra>
// kernel: tpu_custom_call.1
= control target key start
LH: loop header
LB: loop body
LE: loop exit
PB: predicated region body
PF: predicated region fallthrough
CT: control target
= control target key end

     0   :  { %7 = vsyncpa [#allocation3], 0  ;;  %s172_s0 = inlined_call_operand.hbm [shape: f32[8,256], index: 0, kind: input, shape index: {}]   ;;  %s173_s1 = inlined_call_operand.vmem [shape: f32[8,1], index: 1, kind: input, shape index: {}]   ;;  %s174_s2 = inlined_call_operand.hbm [shape: f32[8,256], index: 2, kind: output, shape index: {}]  }
   0x1   :  { %8 = vsyncpa [#allocation4], 0  ;;  %s127_s9 = smov [#allocation2]   ;;  %s79_s13 = scalar_lea.hbm %s172_s0, 256 }
   0x2   :  { %s15_s10 = sshll.u32 %s127_s9, 4  ;;  %p80_p0 = scmp.ne.s32.totalorder %s172_s0, %s79_s13  ;;  %s16_s10 = int_to_ptr.vmem [resolvable:$true] %s15_s10 }
   0x3   :  { %p83_p1 = scmp.lt.u32.totalorder %s79_s13, %s172_s0 }
   0x5   :  { %p85_p2 = pnand %p83_p1, %p80_p0 }
   0x7   :  { %88 = shalt.err (!%p85_p2)
}
   0x8   :  { %s89_s18 = scalar_lea.vmem %s16_s10, 256  ;;  %p94_p4 = scmp.lt.s32.totalorder %s16_s10, %s16_s10 }
   0x9   :  { %p90_p3 = scmp.ne.s32.totalorder %s16_s10, %s89_s18  ;;  %p95_p5 = scmp.lt.s32.totalorder %s89_s18, %s89_s18 }
   0xb   :  { %p96_p6 = por %p95_p5, %p94_p4 }
   0xd   :  { %p97_p7 = pnand %p96_p6, %p90_p3 }
   0xf   :  { %100 = shalt.err (!%p97_p7)
}
  0x10   :  { %18 = dma.hbm_to_vmem [thread:$0]  %s172_s0, 256, %s16_s10, [#allocation3]  }
  0x11   :  { %123 = dma.done.wait [#allocation3], 256  }
  0x12   :  { %124 = vsyncadd [#allocation3], 4294967040  ;;  %v128_v0 = vmov 0   ;;  %v26_v1 = vld [vmem:[%s173_s1] sm:$0xff]  ;;  %v25_v3 = vld [vmem:[#allocation2 + $0x8] sm:$0xff]  ;;  %s129_s0 = smov [#allocation5]  }
  0x13   :  { %70 = vset.pattern.permute.xlu0 %v128_v0  ;;  %v24_v2 = vld [vmem:[#allocation2] sm:$0xff]  ;;  %s56_s23 = sshll.u32 %s129_s0, 4  ;;  %s57_s23 = int_to_ptr.vmem [resolvable:$true] %s56_s23 }
  0x14   :  { %29 = vperm.xlu0 %70, %v26_v1   ;;  %s101_s1 = scalar_lea.vmem %s57_s23, 256  ;;  %p106_p9 = scmp.lt.s32.totalorder %s57_s23, %s57_s23 }
  0x15   :  { %p102_p8 = scmp.ne.s32.totalorder %s57_s23, %s101_s1  ;;  %p107_p10 = scmp.lt.s32.totalorder %s101_s1, %s101_s1 }
  0x17   :  { %p108_p11 = por %p107_p10, %p106_p9 }
  0x19   :  { %p109_p12 = pnand %p108_p11, %p102_p8 }
  0x93   :  { %v30_v4 = vpop.permute.xlu0 %29 }
  0x94   :  { %v32_v5 = vmul.f32 %v30_v4, %v24_v2  ;;  %v33_v6 = vmul.f32 %v30_v4, %v25_v3 }
  0x96   :  { %v65_v7 = vmul.f32 -1.442695, %v32_v5  ;;  %v66_v8 = vmul.f32 -1.442695, %v33_v6 }
  0x98   :  { %71 = vpow2.f32 %v65_v7 }
  0x99   :  { %73 = vpow2.f32 %v66_v8 }
  0xa2   :  { %v72_v9 = vpop.eup %71 }
  0xa3   :  { %v74_v10 = vpop.eup %73  ;;  %v40_v11 = vadd.f32 1.0, %v72_v9 }
  0xa4   :  { %v41_v12 = vadd.f32 1.0, %v74_v10 }
  0xa5   :  { %75 = vrcp.f32 %v40_v11 }
  0xa6   :  { %77 = vrcp.f32 %v41_v12 }
  0xaf   :  { %v76_v13 = vpop.eup %75 }
  0xb0   :  { %v78_v14 = vpop.eup %77  ;;  %v46_v15 = vmul.f32 %v76_v13, %v24_v2 }
  0xb1   :  { %v47_v16 = vmul.f32 %v78_v14, %v25_v3 }
  0xb2   :  { %48 = vst [vmem:[#allocation5] sm:$0xff] %v46_v15 }
  0xb3   :  { %49 = vst [vmem:[#allocation5 + $0x8] sm:$0xff] %v47_v16 }
  0xb4   :  { %112 = shalt.err (!%p109_p12)
}
  0xb5   :  { %s113_s26 = scalar_lea.hbm %s174_s2, 256 }
  0xb6   :  { %p114_p13 = scmp.ne.s32.totalorder %s174_s2, %s113_s26  ;;  %p117_p0 = scmp.lt.u32.totalorder %s113_s26, %s174_s2 }
  0xb8   :  { %p119_p1 = pnand %p117_p0, %p114_p13 }
  0xba   :  { %122 = shalt.err (!%p119_p1)
}
  0xbb   :  { %59 = dma.vmem_to_hbm [thread:$0]  %s57_s23, 256, %s174_s2, [#allocation4]  }
  0xbc   :  { %125 = dma.done.wait [#allocation4], 256  }
  0xbd   :  { %126 = vsyncadd [#allocation4], 4294967040 }
  0xbe   :  { %63 = vsyncpa [#allocation3], 1 }
  0xbf   :  { %64 = vsyncpa [#allocation4], 1 }

</bundles_post_ra>
